<compile_context>
chip_gen: v7x
topology: tpu7x:2x2x1
jax: 0.10.0
libtpu: 0.0.40
codegen_flags: <defaults>
</compile_context>

<pallas_src>
import jax
import jax.numpy as jnp
from jax.experimental import pallas as pl
from jax.experimental.pallas import tpu as pltpu


def _regloss_kernel(logits_ref, afa_ref, ep_ref, t_ref, s_ref, out_ref):
    """One batch tile: writes the un-normalized KL sum for this tile.

    logits_ref : (bB, C)       class logits (C lane-dense)
    afa_ref    : (bB, M)       per-ensemble-member weights
    ep_ref     : (bB, C*M)     ensemble preds, natural (c-major, m-minor) order
    t_ref      : (M, C*M) f32  expand matrix  T[m, c*M+m'] = [m == m']
    s_ref      : (C*M, C) f32  segment matrix S[c*M+m, c'] = [c == c'] / M
    out_ref    : (1, 1, 1) f32 per-tile partial sum
    """
    logits = logits_ref[...].astype(jnp.float32)      # (bB, C)
    afa = afa_ref[...].astype(jnp.float32)            # (bB, M)
    ep = ep_ref[...].astype(jnp.float32)              # (bB, C*M)
    t_mat = t_ref[...]                                # (M, C*M)
    s_mat = s_ref[...]                                # (C*M, C), includes 1/M

    # --- log_softmax over the class axis (last / lane axis) ---
    mx = jnp.max(logits, axis=-1, keepdims=True)
    z = logits - mx
    lse = jnp.log(jnp.sum(jnp.exp(z), axis=-1, keepdims=True))
    glog = z - lse                                    # (bB, C)

    # --- expand afa to the flattened (c, m) lane layout via MXU ---
    # W[b, c*M+m] = afa[b, m]; exact because T is a 0/1 selection matrix.
    w = jnp.dot(afa, t_mat, preferred_element_type=jnp.float32,
                precision=jax.lax.Precision.HIGHEST)  # (bB, C*M)

    # --- weighted-log ensemble target; mean over M done by the S matmul ---
    lw = jnp.log(ep) * w                              # (bB, C*M) lane-dense
    t = jnp.dot(lw, s_mat, preferred_element_type=jnp.float32,
                precision=jax.lax.Precision.HIGHEST)  # (bB, C) lane-dense

    # --- F.kl_div(input=glog, target=t, reduction='none') ---
    # Clamp inside the log only as NaN hygiene; forward value is unchanged
    # because where() selects 0 whenever t <= 0.
    t_safe = jnp.maximum(t, jnp.float32(1e-30))
    kl = jnp.where(t > 0, t * (jnp.log(t_safe) - glog), jnp.float32(0.0))

    # --- per-tile partial of .sum(1) (mean over B done in the wrapper) ---
    per_sample = jnp.sum(kl, axis=-1, keepdims=True)       # (bB, 1)
    partial = jnp.sum(per_sample, axis=0, keepdims=True)   # (1, 1)
    out_ref[...] = partial[None]                            # (1, 1, 1)


def _pick_block_b(batch, flat_width, itemsize,
                  vmem_budget_bytes=2 * 1024 * 1024):
    """Largest batch tile keeping one (padded-lane) e_preds slab within a small
    VMEM budget (Pallas double-buffers it; intermediates add a few more slabs),
    conservative enough for v7x's 64 MiB VMEM."""
    lane_w = ((flat_width + 127) // 128) * 128
    per_row = max(1, lane_w * itemsize)
    bb = max(8, min(512, vmem_budget_bytes // per_row))
    bb = (bb // 8) * 8                        # sublane multiple
    bb = min(bb, ((batch + 7) // 8) * 8)      # never wider than the batch
    return max(8, bb)


def reg_loss(logits_g, afa, e_preds, *, block_b=None, stream_dtype=None):
    """Pallas RegLoss. e_preds is (B, C, M) as in the PyTorch module."""
    B, C = logits_g.shape
    M = afa.shape[1]
    assert e_preds.shape == (B, C, M)
    CM = C * M

    # Optional: stream the big tensors as bf16 from HBM (compute stays f32).
    if stream_dtype is not None:
        logits_g = logits_g.astype(stream_dtype)
        afa = afa.astype(stream_dtype)
        e_preds = e_preds.astype(stream_dtype)

    itemsize = jnp.dtype(e_preds.dtype).itemsize
    if block_b is None:
        block_b = _pick_block_b(B, CM, itemsize)

    # Free (contiguous) reshape -> lane-dense stream, no HBM transpose.
    ep_flat = e_preds.reshape(B, CM)

    # Constant structure matrices for the MXU-based ensemble mean.
    # Note: S is (C*M, C); for very large class counts (C ~ 1000+) it grows as
    # C^2*M and a per-class-blocked variant would be preferable.
    k = jnp.arange(CM, dtype=jnp.int32)
    t_mat = (k[None, :] % M == jnp.arange(M, dtype=jnp.int32)[:, None]
             ).astype(jnp.float32)                                    # (M, C*M)
    s_mat = ((k[:, None] // M == jnp.arange(C, dtype=jnp.int32)[None, :]
              ).astype(jnp.float32) * jnp.float32(1.0 / M))           # (C*M, C)

    # Pad batch to a multiple of block_b with neutral rows:
    #   afa = 0, e_preds = 1  ->  t = 0  ->  kl row = 0 (padding contributes 0).
    b_pad = pl.cdiv(B, block_b) * block_b
    pad = b_pad - B
    if pad:
        logits_g = jnp.pad(logits_g, ((0, pad), (0, 0)))
        afa = jnp.pad(afa, ((0, pad), (0, 0)))
        ep_flat = jnp.pad(ep_flat, ((0, pad), (0, 0)), constant_values=1.0)

    num_blocks = b_pad // block_b

    cost = pl.CostEstimate(
        flops=int(2 * b_pad * M * CM + 2 * b_pad * CM * C
                  + 6 * b_pad * CM + 10 * b_pad * C),
        transcendentals=int(b_pad * CM + 3 * b_pad * C),
        bytes_accessed=int((b_pad * CM + b_pad * C + b_pad * M) * itemsize
                           + (M * CM + CM * C) * 4 + num_blocks * 4),
    )

    partials = pl.pallas_call(
        _regloss_kernel,
        out_shape=jax.ShapeDtypeStruct((num_blocks, 1, 1), jnp.float32),
        grid=(num_blocks,),
        in_specs=[
            pl.BlockSpec((block_b, C), lambda i: (i, 0)),
            pl.BlockSpec((block_b, M), lambda i: (i, 0)),
            pl.BlockSpec((block_b, CM), lambda i: (i, 0)),
            pl.BlockSpec((M, CM), lambda i: (0, 0)),      # constant across grid
            pl.BlockSpec((CM, C), lambda i: (0, 0)),      # constant across grid
        ],
        out_specs=pl.BlockSpec((1, 1, 1), lambda i: (i, 0, 0)),
        compiler_params=pltpu.CompilerParams(
            dimension_semantics=("parallel",)),
        cost_estimate=cost,
    )(logits_g, afa, ep_flat, t_mat, s_mat)

    # Tiny final reduction; normalize by the TRUE batch size, not the padded one.
    return jnp.sum(partials) / jnp.float32(B)


def reg_loss_ref(logits_g, afa, e_preds):
    """Pure-JAX reference for correctness checking."""
    glog = jax.nn.log_softmax(logits_g.astype(jnp.float32), axis=1)
    t = jnp.mean(jnp.log(e_preds.astype(jnp.float32))
                 * afa.astype(jnp.float32)[:, None, :], axis=2)
    kl = jnp.where(t > 0, t * (jnp.log(t) - glog), 0.0)
    return jnp.mean(jnp.sum(kl, axis=1))


if __name__ == "__main__":
    key = jax.random.PRNGKey(0)

    # Case 1: toy shapes implied by the module (batch=2, classes=4, members=8).
    B, C, M = 2, 4, 8
    k1, k2, k3, k4 = jax.random.split(key, 4)
    logits_g = jax.random.normal(k1, (B, C), dtype=jnp.float32)
    afa = jax.random.uniform(k2, (B, M), dtype=jnp.float32, minval=0.0, maxval=2.0)
    e_preds = jax.random.uniform(k3, (B, C, M), dtype=jnp.float32,
                                 minval=0.5, maxval=2.0)

    loss = reg_loss(logits_g, afa, e_preds)
    jax.block_until_ready(loss)
    loss_ref = reg_loss_ref(logits_g, afa, e_preds)
    assert jnp.allclose(loss, loss_ref, rtol=1e-4, atol=1e-4), (loss, loss_ref)

    # Case 2: batch not divisible by the tile -> exercises tail padding,
    # multi-block "parallel" grid and true-B normalization.
    B2, C2, M2 = 37, 10, 5
    j1, j2, j3 = jax.random.split(k4, 3)
    logits2 = jax.random.normal(j1, (B2, C2), dtype=jnp.float32)
    afa2 = jax.random.uniform(j2, (B2, M2), dtype=jnp.float32, minval=0.0, maxval=2.0)
    ep2 = jax.random.uniform(j3, (B2, C2, M2), dtype=jnp.float32,
                             minval=0.5, maxval=2.0)

    loss2 = reg_loss(logits2, afa2, ep2, block_b=16)
    jax.block_until_ready(loss2)
    loss2_ref = reg_loss_ref(logits2, afa2, ep2)
    assert jnp.allclose(loss2, loss2_ref, rtol=1e-4, atol=1e-4), (loss2, loss2_ref)

    print("KERNEL_OK")
</pallas_src>

<mosaic_0001>
module attributes {stable_mosaic.version = 11 : i64} {
  func.func @_regloss_kernel(%arg0: i32, %arg1: memref<8x4xf32, #tpu.memory_space<vmem>>, %arg2: memref<8x8xf32, #tpu.memory_space<vmem>>, %arg3: memref<8x32xf32, #tpu.memory_space<vmem>>, %arg4: memref<8x32xf32, #tpu.memory_space<vmem>>, %arg5: memref<32x4xf32, #tpu.memory_space<vmem>>, %arg6: memref<1x1x1xf32, #tpu.memory_space<vmem>>) attributes {dimension_semantics = [#tpu.dimension_semantics<parallel>], iteration_bounds = array<i64: 1>, scalar_prefetch = 0 : i64, scratch_operands = 0 : i64, tpu.core_type = #tpu.core_type<tc>, window_params = [{transform_indices = @transform_0, window_bounds = array<i64: 8, 4>}, {transform_indices = @transform_1, window_bounds = array<i64: 8, 8>}, {transform_indices = @transform_2, window_bounds = array<i64: 8, 32>}, {pipeline_mode = #tpu.pipeline_mode<synchronous>, transform_indices = @transform_3, window_bounds = array<i64: 8, 32>}, {pipeline_mode = #tpu.pipeline_mode<synchronous>, transform_indices = @transform_4, window_bounds = array<i64: 32, 4>}, {transform_indices = @transform_5, window_bounds = array<i64: 1, 1, 1>}]} {
    %c0 = arith.constant 0 : index
    %c0_0 = arith.constant 0 : index
    %0 = vector.load %arg1[%c0, %c0_0] : memref<8x4xf32, #tpu.memory_space<vmem>>, vector<8x4xf32>
    %c0_1 = arith.constant 0 : index
    %c0_2 = arith.constant 0 : index
    %1 = vector.load %arg2[%c0_1, %c0_2] : memref<8x8xf32, #tpu.memory_space<vmem>>, vector<8x8xf32>
    %c0_3 = arith.constant 0 : index
    %c0_4 = arith.constant 0 : index
    %2 = vector.load %arg3[%c0_3, %c0_4] : memref<8x32xf32, #tpu.memory_space<vmem>>, vector<8x32xf32>
    %c0_5 = arith.constant 0 : index
    %c0_6 = arith.constant 0 : index
    %3 = vector.load %arg4[%c0_5, %c0_6] : memref<8x32xf32, #tpu.memory_space<vmem>>, vector<8x32xf32>
    %c0_7 = arith.constant 0 : index
    %c0_8 = arith.constant 0 : index
    %4 = vector.load %arg5[%c0_7, %c0_8] : memref<32x4xf32, #tpu.memory_space<vmem>>, vector<32x4xf32>
    %cst = arith.constant dense<0xFF800000> : vector<8xf32>
    %5 = vector.multi_reduction <maximumf>, %0, %cst [1] : vector<8x4xf32> to vector<8xf32>
    %6 = vector.shape_cast %5 : vector<8xf32> to vector<8x1xf32>
    %7 = vector.broadcast %6 : vector<8x1xf32> to vector<8x4xf32>
    %8 = arith.subf %0, %7 : vector<8x4xf32>
    %9 = math.exp %8 : vector<8x4xf32>
    %cst_9 = arith.constant dense<0.000000e+00> : vector<8xf32>
    %10 = vector.multi_reduction <add>, %9, %cst_9 [1] : vector<8x4xf32> to vector<8xf32>
    %11 = vector.shape_cast %10 : vector<8xf32> to vector<8x1xf32>
    %12 = math.log %11 : vector<8x1xf32>
    %13 = vector.broadcast %12 : vector<8x1xf32> to vector<8x4xf32>
    %14 = arith.subf %8, %13 : vector<8x4xf32>
    %cst_10 = arith.constant dense<0.000000e+00> : vector<8x32xf32>
    %15 = tpu.matmul %1, %3, %cst_10 {dimension_numbers = #tpu.dot_dimension_numbers<[1], [0], [0], [1], [0, 0, 1, 1], [], []>, precision = #tpu.contract_precision<fp32>} : vector<8x8xf32>, vector<8x32xf32>, vector<8x32xf32> -> vector<8x32xf32>
    %16 = math.log %2 : vector<8x32xf32>
    %17 = arith.mulf %16, %15 : vector<8x32xf32>
    %cst_11 = arith.constant dense<0.000000e+00> : vector<8x4xf32>
    %18 = tpu.matmul %17, %4, %cst_11 {dimension_numbers = #tpu.dot_dimension_numbers<[1], [0], [0], [1], [0, 0, 1, 1], [], []>, precision = #tpu.contract_precision<fp32>} : vector<8x32xf32>, vector<32x4xf32>, vector<8x4xf32> -> vector<8x4xf32>
    %cst_12 = arith.constant 1.000000e-30 : f32
    %19 = vector.broadcast %cst_12 : f32 to vector<8x4xf32>
    %20 = arith.maximumf %18, %19 : vector<8x4xf32>
    %cst_13 = arith.constant 0.000000e+00 : f32
    %21 = vector.broadcast %cst_13 : f32 to vector<8x4xf32>
    %22 = arith.cmpf ogt, %18, %21 : vector<8x4xf32>
    %23 = math.log %20 : vector<8x4xf32>
    %24 = arith.subf %23, %14 : vector<8x4xf32>
    %25 = arith.mulf %18, %24 : vector<8x4xf32>
    %cst_14 = arith.constant 0.000000e+00 : f32
    %26 = vector.broadcast %cst_14 : f32 to vector<8x4xf32>
    %27 = arith.select %22, %25, %26 : vector<8x4xi1>, vector<8x4xf32>
    %cst_15 = arith.constant dense<0.000000e+00> : vector<8xf32>
    %28 = vector.multi_reduction <add>, %27, %cst_15 [1] : vector<8x4xf32> to vector<8xf32>
    %29 = vector.shape_cast %28 : vector<8xf32> to vector<8x1xf32>
    %cst_16 = arith.constant dense<0.000000e+00> : vector<1xf32>
    %30 = vector.multi_reduction <add>, %29, %cst_16 [0] : vector<8x1xf32> to vector<1xf32>
    %31 = vector.shape_cast %30 : vector<1xf32> to vector<1x1xf32>
    %32 = vector.shape_cast %31 : vector<1x1xf32> to vector<1x1x1xf32>
    %c0_17 = arith.constant 0 : index
    %c0_18 = arith.constant 0 : index
    %c0_19 = arith.constant 0 : index
    %33 = vector.load %arg6[%c0_17, %c0_18, %c0_19] : memref<1x1x1xf32, #tpu.memory_space<vmem>>, vector<1x1x1xf32>
    tpu.vector_store %arg6[%c0_17, %c0_18, %c0_19], %32 {strides = array<i32>} : memref<1x1x1xf32, #tpu.memory_space<vmem>>, vector<1x1x1xf32>,
    return
  }
  func.func @transform_0(%arg0: i32) -> (i32, i32) {
    %c0_i32 = arith.constant 0 : i32
    %c0_i32_0 = arith.constant 0 : i32
    return %arg0, %c0_i32 : i32, i32
  }
  func.func @transform_1(%arg0: i32) -> (i32, i32) {
    %c0_i32 = arith.constant 0 : i32
    %c0_i32_0 = arith.constant 0 : i32
    return %arg0, %c0_i32 : i32, i32
  }
  func.func @transform_2(%arg0: i32) -> (i32, i32) {
    %c0_i32 = arith.constant 0 : i32
    %c0_i32_0 = arith.constant 0 : i32
    return %arg0, %c0_i32 : i32, i32
  }
  func.func @transform_3(%arg0: i32) -> (i32, i32) {
    %c0_i32 = arith.constant 0 : i32
    %c0_i32_0 = arith.constant 0 : i32
    %c0_i32_1 = arith.constant 0 : i32
    return %c0_i32, %c0_i32_0 : i32, i32
  }
  func.func @transform_4(%arg0: i32) -> (i32, i32) {
    %c0_i32 = arith.constant 0 : i32
    %c0_i32_0 = arith.constant 0 : i32
    %c0_i32_1 = arith.constant 0 : i32
    return %c0_i32, %c0_i32_0 : i32, i32
  }
  func.func @transform_5(%arg0: i32) -> (i32, i32, i32) {
    %c0_i32 = arith.constant 0 : i32
    %c0_i32_0 = arith.constant 0 : i32
    %c0_i32_1 = arith.constant 0 : i32
    return %arg0, %c0_i32, %c0_i32_0 : i32, i32, i32
  }
}

</mosaic_0001>

<bundles_post_ra>
// kernel: tpu_custom_call.1
= control target key start
LH: loop header
LB: loop body
LE: loop exit
PB: predicated region body
PF: predicated region fallthrough
CT: control target
= control target key end

     0   :  { %vm42_vm0 = vcmask 64512   ;;  %v1244_v3 = vmov 0.0   ;;  %vm1245_vm1 = vmmov 0   ;;  %vm29_vm2 = vcmask 31744   ;;  %s1372_s0 = inlined_call_operand.vmem [shape: f32[8,4], index: 0, kind: input, shape index: {}]   ;;  %s1373_s1 = inlined_call_operand.vmem [shape: f32[8,8], index: 1, kind: input, shape index: {}]   ;;  %s1374_s2 = inlined_call_operand.vmem [shape: f32[8,32], index: 2, kind: input, shape index: {}]   ;;  %s1375_s3 = inlined_call_operand.vmem [shape: f32[8,32], index: 3, kind: input, shape index: {}]   ;;  %s1376_s4 = inlined_call_operand.vmem [shape: f32[32,4], index: 4, kind: input, shape index: {}]   ;;  %s1377_s5 = inlined_call_operand.hbm [shape: f32[1,1,1], index: 5, kind: output, shape index: {}]  }
   0x1   :  { %v24_v0 = vld [vmem:[%s1375_s3] sm:$0xff]  ;;  %1063 = vmatprep.subr.mxu0 %v1244_v3  ;;  %1065 = vmatprep.mubr.msk.f32.mxu0 %vm1245_vm1, %v1244_v3 }
   0x2   :  { %v22_v1 = vld [vmem:[%s1373_s1] sm:$0xff]  ;;  %v47_v4 = vand.u32 4294901760, %v24_v0 }
   0x3   :  { %v1287_v2 = vld [vmem:[%s1372_s0] sm:$0xff]  ;;  %v44_v5 = vsel %vm42_vm0, %v22_v1, 0 }
   0x4   :  { %10 = vsyncpa [#allocation3], 0  ;;  %v112_v6 = vand.u32 4294901760, %v44_v5  ;;  %v30_v7 = vsel %vm29_vm2, %v1287_v2, -inf  ;;  %1058 = vmatprep.subr.mxu1 %v1244_v3  ;;  %1060 = vmatprep.mubr.msk.f32.mxu1 %vm1245_vm1, %v1244_v3  ;;  %v124_v8 = vsub.f32 %v24_v0, %v47_v4  ;;  %v25_v16 = vld [vmem:[%s1376_s4] sm:$0xff]  ;;  %v26_v17 = vld [vmem:[%s1376_s4 + $0x8] sm:$0xff] }
   0x5   :  { %31 = vmax.xlane.f32.xlu0 %v30_v7  ;;  %1059 = vmatpush3.msra.mxu1 %v47_v4  ;;  %v500_v18 = vand.u32 4294901760, %v25_v16  ;;  %v503_v19 = vand.u32 4294901760, %v26_v17  ;;  %v27_v22 = vld [vmem:[%s1376_s4 + $0x10] sm:$0xff]  ;;  %v28_v23 = vld [vmem:[%s1376_s4 + $0x18] sm:$0xff]  ;;  %v1246_v26 = vmov 0.0|0.0   ;;  %v23_v56 = vld [vmem:[%s1374_s2] sm:$0xff] }
   0x6   :  { %v113_v9 = vsub.f32 %v44_v5, %v112_v6  ;;  %v125_v10 = vand.u32 4294901760, %v124_v8  ;;  %v506_v25 = vand.u32 4294901760, %v27_v22  ;;  %1166 = vmatprep.subr.bf16.mxu1 %v1246_v26  ;;  %v509_v27 = vand.u32 4294901760, %v28_v23  ;;  %s1247_s2 = smov [#allocation2]  }
   0x7   :  { %v580_v20 = vsub.f32 %v25_v16, %v500_v18  ;;  %v587_v21 = vsub.f32 %v26_v17, %v503_v19  ;;  %v1328_v31 = vpack.c.bf16 %v503_v19, %v500_v18  ;;  %vm495_vm3 = vcmask 261120   ;;  %s1008_s30 = sshll.u32 %s1247_s2, 4  ;;  %s1009_s30 = int_to_ptr.vmem [resolvable:$true] %s1008_s30 }
   0x8   :  { %v114_v11 = vand.u32 4294901760, %v113_v9  ;;  %v126_v12 = vsub.f32 %v124_v8, %v125_v10  ;;  %v594_v28 = vsub.f32 %v27_v22, %v506_v25  ;;  %v601_v29 = vsub.f32 %v28_v23, %v509_v27  ;;  %s1220_s6 = scalar_lea.vmem %s1009_s30, 16  ;;  %s1224_s7 = scalar_lea.vmem %s1009_s30, 32 }
   0x9   :  { %v1167_v24 = vpack.c.bf16 %v587_v21, %v580_v20  ;;  %v581_v32 = vand.u32 4294901760, %v580_v20  ;;  %v588_v33 = vand.u32 4294901760, %v587_v21  ;;  %v1158_v34 = vpack.c.bf16 %v509_v27, %v506_v25  ;;  %p1221_p0 = scmp.ne.s32.totalorder %s1009_s30, %s1220_s6  ;;  %p1225_p1 = scmp.lt.s32.totalorder %s1009_s30, %s1009_s30 }
   0xa   :  { %v115_v13 = vsub.f32 %v113_v9, %v114_v11  ;;  %v127_v14 = vand.u32 4294901760, %v126_v12  ;;  %v1170_v30 = vpack.c.bf16 %v601_v29, %v594_v28  ;;  %v595_v39 = vand.u32 4294901760, %v594_v28  ;;  %p1226_p2 = scmp.lt.s32.totalorder %s1224_s7, %s1220_s6 }
   0xb   :  { %v582_v35 = vsub.f32 %v580_v20, %v581_v32  ;;  %v589_v36 = vsub.f32 %v587_v21, %v588_v33  ;;  %v602_v40 = vand.u32 4294901760, %v601_v29  ;;  %v1179_v45 = vpack.c.bf16 %v588_v33, %v581_v32 }
   0xc   :  { %v116_v15 = vand.u32 4294901760, %v115_v13  ;;  %1064 = vmatpush3.msra.mxu0 %v127_v14  ;;  %v596_v42 = vsub.f32 %v594_v28, %v595_v39  ;;  %vm1000_vm5 = vcmask 0   ;;  %p1227_p3 = por %p1226_p2, %p1225_p1 }
   0xd   :  { %1066 = vmatmul.mubr.f32.vlgmr.msra.gmra.mrb[0].mxu0 %v112_v6  ;;  %1068 = vmatprep.subr.mxu0 %v1244_v3  ;;  %v583_v37 = vand.u32 4294901760, %v582_v35  ;;  %v590_v38 = vand.u32 4294901760, %v589_v36  ;;  %v603_v43 = vsub.f32 %v601_v29, %v602_v40  ;;  %v1182_v51 = vpack.c.bf16 %v602_v40, %v595_v39 }
   0xe   :  { %1069 = vmatpush3.msra.mxu0 %v124_v8  ;;  %1070 = vmatprep.mubr.msk.f32.mxu0 %vm1245_vm1, %v1244_v3  ;;  %v597_v46 = vand.u32 4294901760, %v596_v42  ;;  %p1228_p4 = pnand %p1227_p3, %p1221_p0 }
   0xf   :  { %1073 = vmatprep.subr.mxu0 %v1244_v3  ;;  %1061 = vmatmul.mubr.f32.vlgmr.msra.gmra.mrb[0].mxu1 %v116_v15  ;;  %v1161_v41 = vpack.c.bf16 %v590_v38, %v583_v37  ;;  %v604_v47 = vand.u32 4294901760, %v603_v43 }
  0x10   :  { %1118 = vmatprep.mubr.msk.f32.mxu1 %vm1245_vm1, %v1244_v3  ;;  %1168 = vmatpush3.bf16.msra.mxu1 %v1167_v24 }
  0x11   :  { %1169 = vmatprep.subr.bf16.mxu1 %v1246_v26  ;;  %v1164_v49 = vpack.c.bf16 %v604_v47, %v597_v46 }
  0x14   :  { %1171 = vmatpush3.bf16.msra.mxu1 %v1170_v30 }
  0x15   :  { %1071 = vmatmul.mubr.f32.vlgmr.msra.gmra.mrb[0].mxu0 %v113_v9  ;;  %1172 = vmatprep.subr.bf16.mxu1 %v1246_v26 }
  0x16   :  { %1074 = vmatpush3.msra.mxu0 %v47_v4  ;;  %1075 = vmatprep.mubr.msk.f32.mxu0 %vm1245_vm1, %v1244_v3 }
  0x17   :  { %1078 = vmatprep.subr.mxu0 %v1244_v3 }
  0x1d   :  { %1076 = vmatmul.mubr.f32.vlgmr.msra.gmra.mrb[0].mxu0 %v114_v11 }
  0x1e   :  { %1079 = vmatpush3.msra.mxu0 %v125_v10  ;;  %1080 = vmatprep.mubr.msk.f32.mxu0 %vm1245_vm1, %v1244_v3 }
  0x1f   :  { %1083 = vmatprep.subr.mxu0 %v1244_v3 }
  0x25   :  { %1081 = vmatmul.mubr.f32.vlgmr.msra.gmra.mrb[0].mxu0 %v112_v6 }
  0x26   :  { %1084 = vmatpush3.msra.mxu0 %v47_v4  ;;  %1085 = vmatprep.mubr.msk.f32.mxu0 %vm1245_vm1, %v1244_v3 }
  0x27   :  { %1154 = vmatprep.subr.bf16.mxu0 %v1246_v26 }
  0x2d   :  { %1086 = vmatmul.mubr.f32.vlgmr.msra.gmra.mrb[0].mxu0 %v112_v6 }
  0x2e   :  { %1096 = vmatprep.mubr.msk.f32.mxu0 %vm1245_vm1, %v1244_v3  ;;  %1156 = vmatpush3.bf16.msra.mxu0 %v1328_v31 }
  0x2f   :  { %1157 = vmatprep.subr.bf16.mxu0 %v1246_v26 }
  0x32   :  { %1159 = vmatpush3.bf16.msra.mxu0 %v1158_v34 }
  0x33   :  { %1160 = vmatprep.subr.bf16.mxu0 %v1246_v26 }
  0x92   :  { %v32_v44 = vpop.xlane.xlu0 %31 }
  0x93   :  { %v1335_v48 = vsub.f32 %v1287_v2, %v32_v44 }
  0x95   :  { %v34_v50 = vmul.f32 1.442695, %v1335_v48 }
  0x97   :  { %1212 = vpow2.f32 %v34_v50 }
  0x98   :  { %1214 = vlog2.f32 %v23_v56 }
  0xa1   :  { %v1213_v52 = vpop.eup %1212 }
  0xa2   :  { %v36_v53 = vsel %vm29_vm2, %v1213_v52, 0.0  ;;  %v1215_v57 = vpop.eup %1214 }
  0xa3   :  { %37 = vadd.xlane.f32.xlu0 %v36_v53  ;;  %v493_v58 = vmul.f32 0.6931472, %v1215_v57 }
  0xe2   :  { %v118_v54 = vpop.f32.mrb[0].mxu1 }
  0xe3   :  { %v1062_v55 = vpop.f32.mrb[1].mxu1 }
 0x100   :  { %v488_v59 = vpop.f32.mrb[0].mxu0 }
 0x101   :  { %v1190_v60 = vadd.f32 %v488_v59, %v118_v54  ;;  %v1087_v61 = vpop.f32.mrb[1].mxu0 }
 0x103   :  { %v494_v62 = vmul.f32 %v1190_v60, %v493_v58 }
 0x105   :  { %v497_v63 = vsel %vm495_vm3, %v494_v62, 0 }
 0x106   :  { %v568_v0 = vand.u32 4294901760, %v497_v63 }
 0x108   :  { %v569_v1 = vsub.f32 %v497_v63, %v568_v0 }
 0x10a   :  { %1119 = vmatmul.mubr.f32.vlgmr.msra.gmra.mrb[2].mxu1 %v569_v1  ;;  %v570_v2 = vand.u32 4294901760, %v569_v1 }
 0x10b   :  { %1174 = vmatpush3.bf16.msra.mxu1 %v1328_v31  ;;  %1129 = vmatprep.mubr.msk.f32.mxu1 %vm1245_vm1, %v1244_v3 }
 0x10c   :  { %1175 = vmatprep.subr.bf16.mxu1 %v1246_v26  ;;  %v571_v4 = vsub.f32 %v569_v1, %v570_v2 }
 0x10e   :  { %v572_v5 = vand.u32 4294901760, %v571_v4 }
 0x10f   :  { %1177 = vmatpush3.bf16.msra.mxu1 %v1158_v34 }
 0x110   :  { %1097 = vmatmul.mubr.f32.vlgmr.msra.gmra.mrb[2].mxu0 %v572_v5  ;;  %1178 = vmatprep.subr.bf16.mxu1 %v1246_v26 }
 0x111   :  { %1162 = vmatpush3.bf16.msra.mxu0 %v1161_v41  ;;  %1107 = vmatprep.mubr.msk.f32.mxu0 %vm1245_vm1, %v1244_v3 }
 0x112   :  { %1130 = vmatmul.mubr.f32.vlgmr.msra.gmra.mrb[2].mxu1 %v570_v2  ;;  %1163 = vmatprep.subr.bf16.mxu0 %v1246_v26 }
 0x113   :  { %1180 = vmatpush3.bf16.msra.mxu1 %v1179_v45  ;;  %1140 = vmatprep.mubr.msk.f32.mxu1 %vm1245_vm1, %v1244_v3 }
 0x114   :  { %1181 = vmatprep.subr.bf16.mxu1 %v1246_v26 }
 0x115   :  { %1165 = vmatpush3.bf16.msra.mxu0 %v1164_v49 }
 0x117   :  { %1183 = vmatpush3.bf16.msra.mxu1 %v1182_v51 }
 0x118   :  { %1108 = vmatmul.mubr.f32.vlgmr.msra.gmra.mrb[2].mxu0 %v568_v0  ;;  %1184 = vmatprep.subr.bf16.mxu1 %v1246_v26 }
 0x11a   :  { %1141 = vmatmul.mubr.f32.vlgmr.msra.gmra.mrb[2].mxu1 %v568_v0 }
 0x11b   :  { %1186 = vmatpush3.bf16.msra.mxu1 %v1328_v31  ;;  %1151 = vmatprep.mubr.msk.f32.mxu1 %vm1245_vm1, %v1244_v3 }
 0x11c   :  { %1187 = vmatprep.subr.bf16.mxu1 %v1246_v26 }
 0x11f   :  { %1189 = vmatpush3.bf16.msra.mxu1 %v1158_v34 }
 0x122   :  { %1152 = vmatmul.mubr.f32.vlgmr.msra.gmra.mrb[2].mxu1 %v568_v0 }
 0x130   :  { %v38_v8 = vpop.xlane.xlu0 %37 }
 0x131   :  { %1216 = vlog2.f32 %v38_v8 }
 0x13b   :  { %v1217_v13 = vpop.eup %1216 }
 0x13c   :  { %v40_v14 = vmul.f32 0.6931472, %v1217_v13 }
 0x13e   :  { %v41_v16 = vsub.f32 %v1335_v48, %v40_v14 }
 0x1eb   :  { %v665_v6 = vpop.f32.mrb[2].mxu0 }
 0x1ec   :  { %v1109_v7 = vpop.f32.mrb[3].mxu0 }
 0x1f5   :  { %v980_v9 = vpop.f32.mrb[2].mxu1 }
 0x1f6   :  { %v1191_v10 = vadd.f32 %v980_v9, %v665_v6  ;;  %v1153_v11 = vpop.f32.mrb[3].mxu1 }
 0x1f8   :  { %v984_v12 = vmax.f32 %v1191_v10, 1e-30  ;;  %vm985_vm4 = vcmp.gt.f32.partialorder %v1191_v10, 0.0 }
 0x1fa   :  { %1218 = vlog2.f32 %v984_v12 }
 0x204   :  { %v1219_v15 = vpop.eup %1218 }
 0x205   :  { %v987_v17 = vmul.f32 0.6931472, %v1219_v15 }
 0x207   :  { %v988_v3 = vsub.f32 %v987_v17, %v41_v16 }
 0x209   :  { %v989_v18 = vmul.f32 %v1191_v10, %v988_v3 }
 0x20b   :  { %v990_v19 = vsel %vm985_vm4, %v989_v18, 0.0 }
 0x20c   :  { %v991_v20 = vsel %vm29_vm2, %v990_v19, 0.0 }
 0x20d   :  { %992 = vadd.xlane.f32.xlu1 %v991_v20 }
 0x29a   :  { %v993_v21 = vpop.xlane.xlu1 %992 }
 0x29b   :  { %v994_v22 = vrot.slane %v993_v21, 4 }
 0x29d   :  { %v995_v23 = vadd.f32 %v994_v22, %v993_v21 }
 0x29f   :  { %v996_v24 = vrot.slane %v995_v23, 2 }
 0x2a1   :  { %v997_v25 = vadd.f32 %v996_v24, %v995_v23 }
 0x2a3   :  { %v998_v26 = vrot.slane %v997_v25, 1 }
 0x2a5   :  { %v999_v27 = vadd.f32 %v998_v26, %v997_v25 }
 0x2a7   :  { %1001 = vst.msk [vmem:[#allocation2] sm:$0x1] %vm1000_vm5, %v999_v27 }
 0x2a8   :  { %1231 = shalt.err (!%p1228_p4)
}
 0x2a9   :  { %s1232_s10 = scalar_lea.hbm %s1377_s5, 16 }
 0x2aa   :  { %p1233_p5 = scmp.ne.s32.totalorder %s1377_s5, %s1232_s10  ;;  %p1236_p6 = scmp.lt.u32.totalorder %s1232_s10, %s1377_s5 }
 0x2ac   :  { %p1238_p7 = pnand %p1236_p6, %p1233_p5 }
 0x2ae   :  { %1241 = shalt.err (!%p1238_p7)
}
 0x2af   :  { %1011 = dma.vmem_to_hbm [thread:$0]  %s1009_s30, 16, %s1377_s5, [#allocation3]  }
 0x2b0   :  { %1242 = dma.done.wait [#allocation3], 16  }
 0x2b1   :  { %1243 = vsyncadd [#allocation3], 4294967280 }
 0x2b2   :  { %1015 = vsyncpa [#allocation3], 1 }

</bundles_post_ra>
